<compile_context>
chip_gen: v7x
topology: tpu7x:2x2x1
jax: 0.10.0
libtpu: 0.0.40
codegen_flags: <defaults>
</compile_context>

<pallas_src>
import functools
import math

import jax
import jax.numpy as jnp
from jax import lax
from jax.experimental import pallas as pl
from jax.experimental.pallas import tpu as pltpu

KH, KW = 3, 3
SH, SW = 2, 2
SUB_CONST = 42.0


def _ceil_out(size, k, s):
    # PyTorch ceil_mode output size (no padding); last window must start in-bounds.
    out = math.ceil((size - k) / s) + 1
    if (out - 1) * s >= size:
        out -= 1
    return max(out, 1)


def _min_value(dtype):
    dtype = jnp.dtype(dtype)
    if jnp.issubdtype(dtype, jnp.floating):
        return float(jnp.finfo(dtype).min)
    return int(jnp.iinfo(dtype).min)


def _maxpool_sub_kernel(x_ref, o_ref, hm_ref, hmT_ref, *, H, W, OH, OW, CG,
                        n_chunks, OH_full, pad_w, min_val):
    # x_ref  : (nc_blk, H, W)        native-layout input block (W on lanes)
    # o_ref  : (nc_blk*OH, OW)       native-layout output block (OW on lanes)
    # hm_ref : (CG*OH, W)            H-reduced rows for one channel chunk
    # hmT_ref: (W + pad_w, CG*OH)    transposed chunk (W on sublanes, (c,oh) lanes)
    L = CG * OH

    if pad_w:
        # Identity element for max in the single ceil_mode overflow column.
        hmT_ref[pl.ds(W, 1), :] = jnp.full((1, L), min_val, hmT_ref.dtype)

    def chunk_body(ck, carry):
        c0 = ck * CG

        # ---- pass 1: H (sublane) reduction, stride-2 strided loads ----
        def ch_body(g, carry2):
            c = c0 + g
            t01 = jnp.maximum(
                x_ref[c, pl.ds(0, OH, stride=SH), :],
                x_ref[c, pl.ds(1, OH, stride=SH), :],
            )
            r0 = g * OH
            if OH % 8 == 0:
                r0 = pl.multiple_of(r0, 8)
            if OH_full == OH:
                t2 = x_ref[c, pl.ds(2, OH, stride=SH), :]
                hm_ref[pl.ds(r0, OH), :] = jnp.maximum(t01, t2)
            elif OH_full > 0:
                # Last output row's 3rd tap is out of bounds (even H): it is
                # already covered by t01 (rows H-2, H-1), so only fix the rest.
                t2 = x_ref[c, pl.ds(2, OH_full, stride=SH), :]
                hm_ref[pl.ds(r0, OH), :] = t01
                hm_ref[pl.ds(r0, OH_full), :] = jnp.maximum(t01[:OH_full, :], t2)
            else:
                hm_ref[pl.ds(r0, OH), :] = t01
            return carry2

        lax.fori_loop(0, CG, ch_body, 0, unroll=min(CG, 4))

        # ---- relayout (XLU, otherwise idle): (c,oh) -> lanes, W -> sublanes ----
        hmT_ref[pl.ds(0, W), :] = hm_ref[...].T

        # ---- pass 2: W (now sublane) reduction, fold in the -42 ----
        res = jnp.maximum(
            jnp.maximum(
                hmT_ref[pl.ds(0, OW, stride=SW), :],
                hmT_ref[pl.ds(1, OW, stride=SW), :],
            ),
            hmT_ref[pl.ds(2, OW, stride=SW), :],
        )  # (OW, L)
        o0 = ck * L
        if L % 8 == 0:
            o0 = pl.multiple_of(o0, 8)
        o_ref[pl.ds(o0, L), :] = (res.T - SUB_CONST).astype(o_ref.dtype)
        return carry

    lax.fori_loop(0, n_chunks, chunk_body, 0, unroll=False)


def unused_indices_forward(x):
    """x: NCHW -> (N, C, OH, OW) = maxpool3x3/s2(ceil_mode=True)(x) - 42."""
    N, C, H, W = x.shape
    OH = _ceil_out(H, KH, SH)
    OW = _ceil_out(W, KW, SW)
    NC = N * C
    itemsize = jnp.dtype(x.dtype).itemsize

    # ceil_mode boundary bookkeeping (all static):
    pad_w = max(0, 2 * OW + 1 - W)                       # 0 (odd W) or 1 (even W)
    OH_full = min(OH, (H - KH) // SH + 1) if H >= KH else 0

    def _pad8(n):
        return -(-n // 8) * 8

    def _pad128(n):
        return -(-n // 128) * 128

    # Generation-aware VMEM budget (v7x: 64 MiB/TC, v5e/v6e: 128 MiB physical).
    try:
        vmem_cap = int(pltpu.get_tpu_info().vmem_capacity_bytes)
    except Exception:
        vmem_cap = 64 * 1024 * 1024
    budget = min(max(vmem_cap // 4, 8 << 20), 48 << 20)

    # VMEM bytes per channel for one (input block + output block), tile-padded.
    per_ch = (_pad8(H) * _pad128(W) + OH * _pad128(OW)) * itemsize

    divisors = [d for d in range(1, NC + 1) if NC % d == 0]

    def ok_shape(d):  # output block second-minor dim must be /8 or full extent
        return (d * OH) % 8 == 0 or d == NC

    def fits(d):      # double-buffered input + output blocks
        return 2 * d * per_ch <= budget

    cands = [d for d in divisors if ok_shape(d) and fits(d) and NC // d >= min(2, NC)]
    if not cands:
        cands = [d for d in divisors if ok_shape(d) and fits(d)]
    if cands:
        even = [d for d in cands if (NC // d) % 2 == 0]   # even #steps for v7x megacore
        nc_blk = max(even) if even else max(cands)
    else:
        # TODO(synk): very large H*W needs an extra spatially-tiled (H-halo) grid
        # axis; fall back to the smallest legal channel block.
        nc_blk = min(d for d in divisors if ok_shape(d))
    n_blocks = NC // nc_blk

    # Channel chunk for the in-kernel transpose: CG*OH lanes, bounded so the
    # transposed value stays comfortably inside the vreg file.
    cg_divs = [d for d in range(1, nc_blk + 1)
               if nc_blk % d == 0 and d * OH <= 512
               and d * OH * W * itemsize <= (96 << 10)]
    CG = max(cg_divs) if cg_divs else 1
    n_chunks = nc_blk // CG

    # Explicit scoped-VMEM limit: 2x (in + out) blocks + scratches + margin.
    block_in = nc_blk * _pad8(H) * _pad128(W) * itemsize
    block_out = _pad8(nc_blk * OH) * _pad128(OW) * itemsize
    scratch_b = (_pad8(CG * OH) * _pad128(W)
                 + _pad8(W + pad_w) * _pad128(CG * OH)) * itemsize
    vmem_limit = int(min(max(2 * (block_in + block_out) + scratch_b + (4 << 20),
                             16 << 20),
                         max(vmem_cap - (4 << 20), 16 << 20)))

    kernel = functools.partial(
        _maxpool_sub_kernel, H=H, W=W, OH=OH, OW=OW, CG=CG, n_chunks=n_chunks,
        OH_full=OH_full, pad_w=pad_w, min_val=_min_value(x.dtype))

    out2d = pl.pallas_call(
        kernel,
        out_shape=jax.ShapeDtypeStruct((NC * OH, OW), x.dtype),
        grid_spec=pltpu.PrefetchScalarGridSpec(
            num_scalar_prefetch=0,
            grid=(n_blocks,),
            in_specs=[pl.BlockSpec((nc_blk, H, W), lambda i: (i, 0, 0))],
            out_specs=pl.BlockSpec((nc_blk * OH, OW), lambda i: (i, 0)),
            scratch_shapes=[
                pltpu.VMEM((CG * OH, W), x.dtype),
                pltpu.VMEM((W + pad_w, CG * OH), x.dtype),
            ],
        ),
        compiler_params=pltpu.CompilerParams(
            dimension_semantics=("parallel",),
            vmem_limit_bytes=vmem_limit,
        ),
    )(x.reshape(NC, H, W))

    return out2d.reshape(N, C, OH, OW)


def _reference_forward(x):
    """Pure-JAX reference of MaxPool2d(3,3; stride 2; ceil_mode=True) - 42."""
    N, C, H, W = x.shape
    OH = _ceil_out(H, KH, SH)
    OW = _ceil_out(W, KW, SW)
    Hp = (OH - 1) * SH + KH
    Wp = (OW - 1) * SW + KW
    xp = jnp.pad(
        x, ((0, 0), (0, 0), (0, Hp - H), (0, Wp - W)), constant_values=-jnp.inf
    )
    out = jnp.full((N, C, OH, OW), -jnp.inf, x.dtype)
    for kh in range(KH):
        for kw in range(KW):
            out = jnp.maximum(
                out, xp[:, :, kh: kh + SH * OH: SH, kw: kw + SW * OW: SW]
            )
    return out - SUB_CONST


if __name__ == "__main__":
    key = jax.random.PRNGKey(0)
    x = jax.random.normal(key, (2, 4, 16, 16), dtype=jnp.float32)

    y = jax.jit(unused_indices_forward)(x)
    y = jax.block_until_ready(y)

    y_ref = _reference_forward(x)
    assert y.shape == (2, 4, 8, 8), y.shape
    assert y.dtype == jnp.float32, y.dtype
    assert jnp.allclose(y, y_ref, atol=1e-6), "Pallas result mismatch vs reference"

    print("KERNEL_OK")
</pallas_src>

<mosaic_0001>
module attributes {stable_mosaic.version = 11 : i64} {
  func.func @_maxpool_sub_kernel(%arg0: i32, %arg1: memref<4x16x16xf32, #tpu.memory_space<vmem>>, %arg2: memref<32x8xf32, #tpu.memory_space<vmem>>, %arg3: memref<32x16xf32, #tpu.memory_space<vmem>>, %arg4: memref<17x32xf32, #tpu.memory_space<vmem>>) attributes {dimension_semantics = [#tpu.dimension_semantics<parallel>], iteration_bounds = array<i64: 2>, scalar_prefetch = 0 : i64, scratch_operands = 2 : i64, tpu.core_type = #tpu.core_type<tc>, window_params = [{transform_indices = @transform_0, window_bounds = array<i64: 4, 16, 16>}, {transform_indices = @transform_1, window_bounds = array<i64: 32, 8>}]} {
    %cst = arith.constant -3.40282347E+38 : f32
    %0 = vector.broadcast %cst : f32 to vector<1x32xf32>
    %c16 = arith.constant 16 : index
    %c0 = arith.constant 0 : index
    %1 = vector.load %arg4[%c16, %c0] : memref<17x32xf32, #tpu.memory_space<vmem>>, vector<1x32xf32>
    tpu.vector_store %arg4[%c16, %c0], %0 {strides = array<i32>} : memref<17x32xf32, #tpu.memory_space<vmem>>, vector<1x32xf32>,
    %c0_i32 = arith.constant 0 : i32
    %c4_i32 = arith.constant 4 : i32
    %2 = arith.muli %c0_i32, %c4_i32 : i32
    %c0_i32_0 = arith.constant 0 : i32
    %3 = arith.addi %2, %c0_i32_0 : i32
    %4 = arith.index_cast %3 : i32 to index
    %c0_1 = arith.constant 0 : index
    %c0_2 = arith.constant 0 : index
    %5 = tpu.strided_load %arg1[%4, %c0_1, %c0_2] {strides = array<i32: 1, 2, 1>} : memref<4x16x16xf32, #tpu.memory_space<vmem>>, vector<1x8x16xf32>
    %6 = vector.shape_cast %5 : vector<1x8x16xf32> to vector<8x16xf32>
    %7 = arith.index_cast %3 : i32 to index
    %c1 = arith.constant 1 : index
    %c0_3 = arith.constant 0 : index
    %8 = tpu.strided_load %arg1[%7, %c1, %c0_3] {strides = array<i32: 1, 2, 1>} : memref<4x16x16xf32, #tpu.memory_space<vmem>>, vector<1x8x16xf32>
    %9 = vector.shape_cast %8 : vector<1x8x16xf32> to vector<8x16xf32>
    %10 = arith.maximumf %6, %9 : vector<8x16xf32>
    %c8_i32 = arith.constant 8 : i32
    %11 = arith.muli %c0_i32_0, %c8_i32 : i32
    %12 = tpu.assume_multiple %11, 8 : i32
    %13 = arith.index_cast %3 : i32 to index
    %c2 = arith.constant 2 : index
    %c0_4 = arith.constant 0 : index
    %14 = tpu.strided_load %arg1[%13, %c2, %c0_4] {strides = array<i32: 1, 2, 1>} : memref<4x16x16xf32, #tpu.memory_space<vmem>>, vector<1x7x16xf32>
    %15 = vector.shape_cast %14 : vector<1x7x16xf32> to vector<7x16xf32>
    %16 = arith.index_cast %12 : i32 to index
    %c0_5 = arith.constant 0 : index
    %17 = vector.load %arg3[%16, %c0_5] : memref<32x16xf32, #tpu.memory_space<vmem>>, vector<8x16xf32>
    tpu.vector_store %arg3[%16, %c0_5], %10 {strides = array<i32>} : memref<32x16xf32, #tpu.memory_space<vmem>>, vector<8x16xf32>,
    %18 = vector.extract_strided_slice %10 {offsets = [0, 0], sizes = [7, 16], strides = [1, 1]} : vector<8x16xf32> to vector<7x16xf32>
    %19 = arith.maximumf %18, %15 : vector<7x16xf32>
    %20 = arith.index_cast %12 : i32 to index
    %c0_6 = arith.constant 0 : index
    %21 = vector.load %arg3[%20, %c0_6] : memref<32x16xf32, #tpu.memory_space<vmem>>, vector<7x16xf32>
    tpu.vector_store %arg3[%20, %c0_6], %19 {strides = array<i32>} : memref<32x16xf32, #tpu.memory_space<vmem>>, vector<7x16xf32>,
    %c1_i32 = arith.constant 1 : i32
    %22 = arith.addi %2, %c1_i32 : i32
    %23 = arith.index_cast %22 : i32 to index
    %c0_7 = arith.constant 0 : index
    %c0_8 = arith.constant 0 : index
    %24 = tpu.strided_load %arg1[%23, %c0_7, %c0_8] {strides = array<i32: 1, 2, 1>} : memref<4x16x16xf32, #tpu.memory_space<vmem>>, vector<1x8x16xf32>
    %25 = vector.shape_cast %24 : vector<1x8x16xf32> to vector<8x16xf32>
    %26 = arith.index_cast %22 : i32 to index
    %c1_9 = arith.constant 1 : index
    %c0_10 = arith.constant 0 : index
    %27 = tpu.strided_load %arg1[%26, %c1_9, %c0_10] {strides = array<i32: 1, 2, 1>} : memref<4x16x16xf32, #tpu.memory_space<vmem>>, vector<1x8x16xf32>
    %28 = vector.shape_cast %27 : vector<1x8x16xf32> to vector<8x16xf32>
    %29 = arith.maximumf %25, %28 : vector<8x16xf32>
    %c8_i32_11 = arith.constant 8 : i32
    %30 = arith.muli %c1_i32, %c8_i32_11 : i32
    %31 = tpu.assume_multiple %30, 8 : i32
    %32 = arith.index_cast %22 : i32 to index
    %c2_12 = arith.constant 2 : index
    %c0_13 = arith.constant 0 : index
    %33 = tpu.strided_load %arg1[%32, %c2_12, %c0_13] {strides = array<i32: 1, 2, 1>} : memref<4x16x16xf32, #tpu.memory_space<vmem>>, vector<1x7x16xf32>
    %34 = vector.shape_cast %33 : vector<1x7x16xf32> to vector<7x16xf32>
    %35 = arith.index_cast %31 : i32 to index
    %c0_14 = arith.constant 0 : index
    %36 = vector.load %arg3[%35, %c0_14] : memref<32x16xf32, #tpu.memory_space<vmem>>, vector<8x16xf32>
    tpu.vector_store %arg3[%35, %c0_14], %29 {strides = array<i32>} : memref<32x16xf32, #tpu.memory_space<vmem>>, vector<8x16xf32>,
    %37 = vector.extract_strided_slice %29 {offsets = [0, 0], sizes = [7, 16], strides = [1, 1]} : vector<8x16xf32> to vector<7x16xf32>
    %38 = arith.maximumf %37, %34 : vector<7x16xf32>
    %39 = arith.index_cast %31 : i32 to index
    %c0_15 = arith.constant 0 : index
    %40 = vector.load %arg3[%39, %c0_15] : memref<32x16xf32, #tpu.memory_space<vmem>>, vector<7x16xf32>
    tpu.vector_store %arg3[%39, %c0_15], %38 {strides = array<i32>} : memref<32x16xf32, #tpu.memory_space<vmem>>, vector<7x16xf32>,
    %c2_i32 = arith.constant 2 : i32
    %41 = arith.addi %2, %c2_i32 : i32
    %42 = arith.index_cast %41 : i32 to index
    %c0_16 = arith.constant 0 : index
    %c0_17 = arith.constant 0 : index
    %43 = tpu.strided_load %arg1[%42, %c0_16, %c0_17] {strides = array<i32: 1, 2, 1>} : memref<4x16x16xf32, #tpu.memory_space<vmem>>, vector<1x8x16xf32>
    %44 = vector.shape_cast %43 : vector<1x8x16xf32> to vector<8x16xf32>
    %45 = arith.index_cast %41 : i32 to index
    %c1_18 = arith.constant 1 : index
    %c0_19 = arith.constant 0 : index
    %46 = tpu.strided_load %arg1[%45, %c1_18, %c0_19] {strides = array<i32: 1, 2, 1>} : memref<4x16x16xf32, #tpu.memory_space<vmem>>, vector<1x8x16xf32>
    %47 = vector.shape_cast %46 : vector<1x8x16xf32> to vector<8x16xf32>
    %48 = arith.maximumf %44, %47 : vector<8x16xf32>
    %c8_i32_20 = arith.constant 8 : i32
    %49 = arith.muli %c2_i32, %c8_i32_20 : i32
    %50 = tpu.assume_multiple %49, 8 : i32
    %51 = arith.index_cast %41 : i32 to index
    %c2_21 = arith.constant 2 : index
    %c0_22 = arith.constant 0 : index
    %52 = tpu.strided_load %arg1[%51, %c2_21, %c0_22] {strides = array<i32: 1, 2, 1>} : memref<4x16x16xf32, #tpu.memory_space<vmem>>, vector<1x7x16xf32>
    %53 = vector.shape_cast %52 : vector<1x7x16xf32> to vector<7x16xf32>
    %54 = arith.index_cast %50 : i32 to index
    %c0_23 = arith.constant 0 : index
    %55 = vector.load %arg3[%54, %c0_23] : memref<32x16xf32, #tpu.memory_space<vmem>>, vector<8x16xf32>
    tpu.vector_store %arg3[%54, %c0_23], %48 {strides = array<i32>} : memref<32x16xf32, #tpu.memory_space<vmem>>, vector<8x16xf32>,
    %56 = vector.extract_strided_slice %48 {offsets = [0, 0], sizes = [7, 16], strides = [1, 1]} : vector<8x16xf32> to vector<7x16xf32>
    %57 = arith.maximumf %56, %53 : vector<7x16xf32>
    %58 = arith.index_cast %50 : i32 to index
    %c0_24 = arith.constant 0 : index
    %59 = vector.load %arg3[%58, %c0_24] : memref<32x16xf32, #tpu.memory_space<vmem>>, vector<7x16xf32>
    tpu.vector_store %arg3[%58, %c0_24], %57 {strides = array<i32>} : memref<32x16xf32, #tpu.memory_space<vmem>>, vector<7x16xf32>,
    %c3_i32 = arith.constant 3 : i32
    %60 = arith.addi %2, %c3_i32 : i32
    %61 = arith.index_cast %60 : i32 to index
    %c0_25 = arith.constant 0 : index
    %c0_26 = arith.constant 0 : index
    %62 = tpu.strided_load %arg1[%61, %c0_25, %c0_26] {strides = array<i32: 1, 2, 1>} : memref<4x16x16xf32, #tpu.memory_space<vmem>>, vector<1x8x16xf32>
    %63 = vector.shape_cast %62 : vector<1x8x16xf32> to vector<8x16xf32>
    %64 = arith.index_cast %60 : i32 to index
    %c1_27 = arith.constant 1 : index
    %c0_28 = arith.constant 0 : index
    %65 = tpu.strided_load %arg1[%64, %c1_27, %c0_28] {strides = array<i32: 1, 2, 1>} : memref<4x16x16xf32, #tpu.memory_space<vmem>>, vector<1x8x16xf32>
    %66 = vector.shape_cast %65 : vector<1x8x16xf32> to vector<8x16xf32>
    %67 = arith.maximumf %63, %66 : vector<8x16xf32>
    %c8_i32_29 = arith.constant 8 : i32
    %68 = arith.muli %c3_i32, %c8_i32_29 : i32
    %69 = tpu.assume_multiple %68, 8 : i32
    %70 = arith.index_cast %60 : i32 to index
    %c2_30 = arith.constant 2 : index
    %c0_31 = arith.constant 0 : index
    %71 = tpu.strided_load %arg1[%70, %c2_30, %c0_31] {strides = array<i32: 1, 2, 1>} : memref<4x16x16xf32, #tpu.memory_space<vmem>>, vector<1x7x16xf32>
    %72 = vector.shape_cast %71 : vector<1x7x16xf32> to vector<7x16xf32>
    %73 = arith.index_cast %69 : i32 to index
    %c0_32 = arith.constant 0 : index
    %74 = vector.load %arg3[%73, %c0_32] : memref<32x16xf32, #tpu.memory_space<vmem>>, vector<8x16xf32>
    tpu.vector_store %arg3[%73, %c0_32], %67 {strides = array<i32>} : memref<32x16xf32, #tpu.memory_space<vmem>>, vector<8x16xf32>,
    %75 = vector.extract_strided_slice %67 {offsets = [0, 0], sizes = [7, 16], strides = [1, 1]} : vector<8x16xf32> to vector<7x16xf32>
    %76 = arith.maximumf %75, %72 : vector<7x16xf32>
    %77 = arith.index_cast %69 : i32 to index
    %c0_33 = arith.constant 0 : index
    %78 = vector.load %arg3[%77, %c0_33] : memref<32x16xf32, #tpu.memory_space<vmem>>, vector<7x16xf32>
    tpu.vector_store %arg3[%77, %c0_33], %76 {strides = array<i32>} : memref<32x16xf32, #tpu.memory_space<vmem>>, vector<7x16xf32>,
    %c4_i32_34 = arith.constant 4 : i32
    %c0_35 = arith.constant 0 : index
    %c0_36 = arith.constant 0 : index
    %79 = vector.load %arg3[%c0_35, %c0_36] : memref<32x16xf32, #tpu.memory_space<vmem>>, vector<32x16xf32>
    %80 = tpu.transpose %79, [1, 0] : vector<32x16xf32> -> vector<16x32xf32>
    %c0_37 = arith.constant 0 : index
    %c0_38 = arith.constant 0 : index
    %81 = vector.load %arg4[%c0_37, %c0_38] : memref<17x32xf32, #tpu.memory_space<vmem>>, vector<16x32xf32>
    tpu.vector_store %arg4[%c0_37, %c0_38], %80 {strides = array<i32>} : memref<17x32xf32, #tpu.memory_space<vmem>>, vector<16x32xf32>,
    %c0_39 = arith.constant 0 : index
    %c0_40 = arith.constant 0 : index
    %82 = tpu.strided_load %arg4[%c0_39, %c0_40] {strides = array<i32: 2, 1>} : memref<17x32xf32, #tpu.memory_space<vmem>>, vector<8x32xf32>
    %c1_41 = arith.constant 1 : index
    %c0_42 = arith.constant 0 : index
    %83 = tpu.strided_load %arg4[%c1_41, %c0_42] {strides = array<i32: 2, 1>} : memref<17x32xf32, #tpu.memory_space<vmem>>, vector<8x32xf32>
    %84 = arith.maximumf %82, %83 : vector<8x32xf32>
    %c2_43 = arith.constant 2 : index
    %c0_44 = arith.constant 0 : index
    %85 = tpu.strided_load %arg4[%c2_43, %c0_44] {strides = array<i32: 2, 1>} : memref<17x32xf32, #tpu.memory_space<vmem>>, vector<8x32xf32>
    %86 = arith.maximumf %84, %85 : vector<8x32xf32>
    %c32_i32 = arith.constant 32 : i32
    %87 = arith.muli %c0_i32, %c32_i32 : i32
    %88 = tpu.assume_multiple %87, 8 : i32
    %89 = tpu.transpose %86, [1, 0] : vector<8x32xf32> -> vector<32x8xf32>
    %cst_45 = arith.constant 4.200000e+01 : f32
    %90 = vector.broadcast %cst_45 : f32 to vector<32x8xf32>
    %91 = arith.subf %89, %90 : vector<32x8xf32>
    %92 = arith.index_cast %88 : i32 to index
    %c0_46 = arith.constant 0 : index
    %93 = vector.load %arg2[%92, %c0_46] : memref<32x8xf32, #tpu.memory_space<vmem>>, vector<32x8xf32>
    tpu.vector_store %arg2[%92, %c0_46], %91 {strides = array<i32>} : memref<32x8xf32, #tpu.memory_space<vmem>>, vector<32x8xf32>,
    %c1_i32_47 = arith.constant 1 : i32
    return
  }
  func.func @transform_0(%arg0: i32) -> (i32, i32, i32) {
    %c0_i32 = arith.constant 0 : i32
    %c0_i32_0 = arith.constant 0 : i32
    %c0_i32_1 = arith.constant 0 : i32
    return %arg0, %c0_i32, %c0_i32_0 : i32, i32, i32
  }
  func.func @transform_1(%arg0: i32) -> (i32, i32) {
    %c0_i32 = arith.constant 0 : i32
    %c0_i32_0 = arith.constant 0 : i32
    return %arg0, %c0_i32 : i32, i32
  }
}

</mosaic_0001>

<bundles_post_ra>
// kernel: unused_indices_forward.1
= control target key start
LH: loop header
LB: loop body
LE: loop exit
PB: predicated region body
PF: predicated region fallthrough
CT: control target
= control target key end

     0   :  { %6 = vsyncpa [#allocation5], 0  ;;  %s739_s0 = inlined_call_operand.hbm [shape: f32[8,16,16], index: 0, kind: input, shape index: {}]   ;;  %s740_s1 = inlined_call_operand.hbm [shape: f32[64,8], index: 1, kind: output, shape index: {}]  }
   0x1   :  { %8 = vsyncpa [#allocation5 + $0x1], 0 }
   0x2   :  { %9 = vsyncpa [#allocation6], 0 }
   0x3   :  { %11 = vsyncpa [#allocation6 + $0x1], 0  ;;  %s564_s6 = smov 0   ;;  %s566_s7 = smov 0  }
   0x4   :  { %s568_s8 = smov 0   ;;  %s570_s9 = smov 0  }
   0x5 LB: > { %s585_s10 = sadd.s32 4294967295, %s545_s9   ;;  %s364_s11 = sadd.s32 4294967294, %s545_s9   ;;  %s545_s9 = sphi %s570_s9, %s753_s9   ;;  %s541_s8 = sphi %s568_s8, %s752_s8   ;;  %s537_s7 = sphi %s566_s7, %s751_s7   ;;  %s533_s6 = sphi %s564_s6, %s750_s6  }
   0x6   : > { %s589_s12 = sadd.s32 1, %s545_s9   ;;  %s24_s13 = sadd.s32 1, %s541_s8 }
   0x7   : > { %s21_s14 = ssub.s32 %s545_s9, %s589_s12  ;;  %p31_p0 = scmp.ne.s32.totalorder %s541_s8, %s537_s7 }
   0x8   : > { %p22_p1 = scmp.eq.s32.totalorder %s21_s14, 0  ;;  %p32_p2 = scmp.eq.s32.totalorder %s545_s9, 0 }
   0x9   : > { %p37_p3 = scmp.ne.s32.totalorder %s537_s7, %s533_s6  ;;  %p38_p4 = scmp.eq.s32.totalorder %s585_s10, 0 }
   0xa   : > { %s601_s15 = scalar_select %p22_p1, %s541_s8, %s24_s13  }
   0xb   : > { %p603_p5 = por %p32_p2, %p31_p0  ;;  %p607_p6 = por %p38_p4, %p37_p3 }
   0xc   : > { %p61_p7 = scmp.eq.s32.totalorder %s585_s10, 1  ;;  %p67_p8 = scmp.eq.s32.totalorder %s364_s11, 1 }
   0xd   : > { %p409_p10 = scmp.lt.s32.totalorder %s545_s9, 2  ;;  %s87_s20 = sand.u32 1, %s541_s8  }
   0xe   : > { %p614_p11 = por %p61_p7, %p31_p0  ;;  %p618_p12 = por %p67_p8, %p37_p3 }
   0xf   : > { %s395_s21 = sshll.u32 %s545_s9, 10  ;;  %s367_s22 = sshll.u32 %s87_s20, 6 }
  0x10   : > { %s744_s18 = scalar_select %p614_p11, 1, 0 }
  0x11   : > { %s745_s19 = scalar_select %p618_p12, 1, 0 }
  0x12   : > { %s627_s25 = scalar_lea.hbm %s739_s0, %s395_s21  ;;  %s91_s26 = scalar_lea.vmem [#allocation4], %s367_s22 }
  0x13   : > { %s99_s27 = sshll.u32 %s91_s26, 4  ;;  %p631_p13 = pnand %p409_p10, %p603_p5  ;;  %s635_s27 = int_to_ptr.vmem [resolvable:$true] %s99_s27 }
  0x14   : > { %s637_s29 = scalar_lea.sflag [#allocation5], %s87_s20  ;;  %s449_s30 = scalar_lea.hbm %s627_s25, 1024 }
  0x15   : > { %p450_p0 = scmp.ne.s32.totalorder %s627_s25, %s449_s30  ;;  %p451_p1 = pneg %p631_p13 }
  0x16   : > { %s454_s4 = scalar_lea.hbm %s739_s0, 2048  ;;  %p455_p4 = scmp.lt.u32.totalorder %s627_s25, %s739_s0 }
  0x17   : > { %p452_p2 = pnand %p451_p1, %p450_p0  ;;  %p456_p5 = scmp.lt.u32.totalorder %s454_s4, %s449_s30 }
  0x18   : > { %p458_p8 = scmp.lt.u32.totalorder %s449_s30, %s627_s25 }
  0x19   : > { %p453_p3 = pneg %p452_p2  ;;  %p457_p7 = por %p456_p5, %p455_p4 }
  0x1b   : > { %p459_p10 = por %p458_p8, %p457_p7 }
  0x1d   : > { %p460_p9 = pnand %p459_p10, %p453_p3 }
  0x1f   : > { %463 = shalt.err (!%p460_p9)
}
  0x20   : > { %s464_s13 = scalar_lea.vmem %s635_s27, 1024  ;;  %s547_s14 = smov [#allocation4]  }
  0x21   : > { %p465_p0 = scmp.ne.s32.totalorder %s635_s27, %s464_s13  ;;  %s469_s16 = sshll.u32 %s547_s14, 4  ;;  %s470_s16 = int_to_ptr.vmem [resolvable:$false] %s469_s16 }
  0x22   : > { %s471_s20 = scalar_lea.vmem %s470_s16, 2048  ;;  %p472_p11 = scmp.lt.s32.totalorder %s635_s27, %s470_s16 }
  0x23   : > { %p467_p2 = pnand %p465_p0, %p451_p1  ;;  %p473_p4 = scmp.lt.s32.totalorder %s471_s20, %s464_s13 }
  0x25   : > { %p468_p12 = pneg %p467_p2  ;;  %p474_p5 = por %p473_p4, %p472_p11 }
  0x27   : > { %p475_p7 = pnand %p474_p5, %p468_p12 }
  0x29   : > { %478 = shalt.err (!%p475_p7)
}
  0x2a   : > { %s548_s21 = smov 128   ;;  %s549_s22 = smov 8  }
  0x2b   : > { %404 = dma.hbm_to_vmem [thread:$0]  (!%p631_p13), %s627_s25, 1024, %s635_s27, %s637_s29, %s548_s21, %s548_s21, %s549_s22  }
  0x2c   : > { %p371_p9 = scmp.ge.s32.totalorder %s545_s9, 1  ;;  %p107_p1 = scmp.lt.s32.totalorder %s545_s9, 3 }
  0x2e   : > { %p108_p3 = pnand %p371_p9, %p107_p1 }
  0x2f   : > { %s668_s23 = sand.u32 (!%p108_p3), 1, %s537_s7  }
  0x30   : > { %111 = sbr.rel (%p108_p3) target bundleno = 373 (0x175), region = 24  ;;  %s372_s24 = sshll.u32 (!%p108_p3), %s668_s23, 6 }
  0x31   : > { %s114_s26 = scalar_lea.sflag (!%p108_p3), [#allocation5], %s668_s23  ;;  %s117_s30 = scalar_lea.vmem (!%p108_p3), [#allocation4], %s372_s24 }
  0x37   : > { %524 = dma.done.wait (%p607_p6), %s114_s26, 1024  }
  0x38   : > { %526 = vsyncadd (%p607_p6), %s114_s26, 4294966272  ;;  %vm146_vm0 = vcmask 130048   ;;  %v140_v0 = vld [vmem:[%s117_s30] ss:$2 sm:$0xff]  ;;  %v374_v1 = vld [vmem:[%s117_s30 + $0x1] ss:$2 sm:$0xff] }
  0x39   : > { %v376_v2 = vld [vmem:[%s117_s30 + $0x10] ss:$2 sm:$0xff]  ;;  %v143_v3 = vmax.f32 %v140_v0, %v374_v1  ;;  %v375_v4 = vld [vmem:[%s117_s30 + $0x2] ss:$2 sm:$0x7f]  ;;  %vm149_vm1 = vcmask 129024  }
  0x3a   : > { %v377_v5 = vld [vmem:[%s117_s30 + $0x11] ss:$2 sm:$0xff]  ;;  %v378_v7 = vld [vmem:[%s117_s30 + $0x12] ss:$2 sm:$0x7f]  ;;  %vm138_vm2 = vcmask 253952  }
  0x3b   : > { %v155_v6 = vmax.f32 %v376_v2, %v377_v5  ;;  %v379_v8 = vld [vmem:[%s117_s30 + $0x20] ss:$2 sm:$0xff]  ;;  %147 = vst.msk [vmem:[#allocation2] sm:$0xff] %vm146_vm0, %v143_v3  ;;  %v148_v9 = vmax.f32 %v143_v3, %v375_v4  ;;  %v380_v10 = vld [vmem:[%s117_s30 + $0x21] ss:$2 sm:$0xff]  ;;  %vm220_vm3 = vcmask 261120  }
  0x3c   : > { %v381_v11 = vld [vmem:[%s117_s30 + $0x22] ss:$2 sm:$0x7f]  ;;  %v166_v13 = vmax.f32 %v379_v8, %v380_v10  ;;  %v382_v14 = vld [vmem:[%s117_s30 + $0x30] ss:$2 sm:$0xff]  ;;  %s373_s17 = sshll.u32 %s668_s23, 5 }
  0x3d   : > { %159 = vst.msk [vmem:[#allocation2 + $0x8] sm:$0xff] %vm146_vm0, %v155_v6  ;;  %v160_v12 = vmax.f32 %v155_v6, %v378_v7  ;;  %v383_v15 = vld [vmem:[%s117_s30 + $0x31] ss:$2 sm:$0xff]  ;;  %v384_v17 = vld [vmem:[%s117_s30 + $0x32] ss:$2 sm:$0x7f] }
  0x3e   : > { %150 = vst.msk [vmem:[#allocation2] sm:$0x7f] %vm149_vm1, %v148_v9  ;;  %v177_v16 = vmax.f32 %v382_v14, %v383_v15  ;;  %v171_v18 = vmax.f32 %v166_v13, %v381_v11  ;;  %v550_v23 = vmov -3.4028235e+38   ;;  %vm266_vm4 = vcmask 64512   ;;  %s135_s25 = scalar_lea.vmem [#allocation7], %s373_s17 }
  0x3f   : > { %161 = vst.msk [vmem:[#allocation2 + $0x8] sm:$0x7f] %vm149_vm1, %v160_v12  ;;  %s285_s27 = sshll.u32 %s135_s25, 4  ;;  %s396_s28 = sshll.u32 %s585_s10, 9  ;;  %s688_s27 = int_to_ptr.vmem [resolvable:$true] %s285_s27 }
  0x40   : > { %170 = vst.msk [vmem:[#allocation2 + $0x10] sm:$0xff] %vm146_vm0, %v166_v13  ;;  %181 = vst.msk [vmem:[#allocation2 + $0x18] sm:$0xff] %vm146_vm0, %v177_v16  ;;  %v182_v19 = vmax.f32 %v177_v16, %v384_v17  ;;  %s694_s3 = scalar_lea.hbm %s740_s1, %s396_s28  ;;  %s272_s4 = scalar_lea.sflag [#allocation6], %s668_s23 }
  0x41   : > { %172 = vst.msk [vmem:[#allocation2 + $0x10] sm:$0x7f] %vm149_vm1, %v171_v18  ;;  %s479_s5 = scalar_lea.vmem %s688_s27, 512  ;;  %p747_p11 = scmp.ne.s32.totalorder %s744_s18, 0 }
  0x42   : > { %183 = vst.msk [vmem:[#allocation2 + $0x18] sm:$0x7f] %vm149_vm1, %v182_v19  ;;  %p480_p6 = scmp.ne.s32.totalorder %s688_s27, %s479_s5  ;;  %s551_s10 = smov [#allocation7]  }
  0x43   : > { %139 = vst.msk [vmem:[#allocation3 + $0x10] sm:$0x1] %vm138_vm2, %v550_v23  ;;  %s483_s11 = sshll.u32 %s551_s10, 4  ;;  %s484_s11 = int_to_ptr.vmem [resolvable:$false] %s483_s11 }
  0x44   : > { %p481_p12 = pnand %p480_p6, %p747_p11  ;;  %s485_s13 = scalar_lea.vmem %s484_s11, 1024 }
  0x45   : > { %v184_v20 = vld [vmem:[#allocation2] sm:$0xff]  ;;  %p486_p8 = scmp.lt.s32.totalorder %s688_s27, %s484_s11  ;;  %p487_p10 = scmp.lt.s32.totalorder %s485_s13, %s479_s5 }
  0x46   : > { %188 = vxpose.xlu0.b32.start [1/4] (short) (narrow) %v184_v20, 16  ;;  %v185_v21 = vld [vmem:[#allocation2 + $0x8] sm:$0xff]  ;;  %p482_p13 = pneg %p481_p12 }
  0x47   : > { %p488_p0 = por %p487_p10, %p486_p8 }
  0x48   : > { %v186_v22 = vld [vmem:[#allocation2 + $0x10] sm:$0xff] }
  0x49   : > { %v187_v24 = vld [vmem:[#allocation2 + $0x18] sm:$0xff]  ;;  %p489_p2 = pnand %p488_p0, %p482_p13 }
  0x4a   : > { %189 = vxpose.xlu0.b32.cont [2/4] (short) (narrow) %v185_v21, 16 }
  0x4e   : > { %190 = vxpose.xlu0.b32.cont [3/4] (short) (narrow) %v186_v22, 16 }
  0x52   : > { %191 = vxpose.xlu0.b32.end [4/4] (short) (narrow) %v187_v24, 16 }
  0xc6   : > { %v204_v25 = vpop.trf.xlu0 }
  0xc7   : > { %221 = vst.msk [vmem:[#allocation3] sm:$0xff] %vm220_vm3, %v204_v25 }
  0xca   : > { %v205_v26 = vpop.trf.xlu0 }
  0xcb   : > { %222 = vst.msk [vmem:[#allocation3 + $0x8] sm:$0xff] %vm220_vm3, %v205_v26 }
  0xd2   : > { %v223_v27 = vld [vmem:[#allocation3] ss:$2 sm:$0xff]  ;;  %v225_v28 = vld [vmem:[#allocation3 + $0x1] ss:$2 sm:$0xff] }
  0xd3   : > { %v226_v29 = vmax.f32 %v223_v27, %v225_v28  ;;  %v228_v30 = vld [vmem:[#allocation3 + $0x2] ss:$2 sm:$0xff] }
  0xd5   : > { %v229_v31 = vmax.f32 %v226_v29, %v228_v30 }
  0xd7   : > { %230 = vxpose.xlu1.b32.start.end [1/1] (short) (narrow) %v229_v31, 32 }
 0x157   : > { %v246_v32 = vpop.trf.xlu1 }
 0x158   : > { %v385_v33 = vadd.f32 -42.0, %v246_v32 }
 0x15a   : > { %267 = vst.msk [vmem:[%s135_s25] sm:$0xff] %vm266_vm4, %v385_v33 }
 0x15b   : > { %v247_v34 = vpop.trf.xlu1 }
 0x15c   : > { %v386_v35 = vadd.f32 -42.0, %v247_v34 }
 0x15e   : > { %268 = vst.msk [vmem:[%s135_s25 + $0x8] sm:$0xff] %vm266_vm4, %v386_v35 }
 0x15f   : > { %v248_v36 = vpop.trf.xlu1 }
 0x160   : > { %v387_v37 = vadd.f32 -42.0, %v248_v36 }
 0x162   : > { %269 = vst.msk [vmem:[%s135_s25 + $0x10] sm:$0xff] %vm266_vm4, %v387_v37 }
 0x163   : > { %v249_v38 = vpop.trf.xlu1 }
 0x164   : > { %v388_v39 = vadd.f32 -42.0, %v249_v38 }
 0x166   : > { %270 = vst.msk [vmem:[%s135_s25 + $0x18] sm:$0xff] %vm266_vm4, %v388_v39 }
 0x167   : > { %492 = shalt.err (!%p489_p2)
}
 0x168   : > { %s493_s14 = scalar_lea.hbm %s694_s3, 512  ;;  %s497_s21 = scalar_lea.hbm %s740_s1, 1024 }
 0x169   : > { %p494_p4 = scmp.ne.s32.totalorder %s694_s3, %s493_s14  ;;  %p498_p9 = scmp.lt.u32.totalorder %s694_s3, %s740_s1 }
 0x16a   : > { %p499_p1 = scmp.lt.u32.totalorder %s497_s21, %s493_s14  ;;  %p501_p6 = scmp.lt.u32.totalorder %s493_s14, %s694_s3 }
 0x16b   : > { %p495_p5 = pnand %p494_p4, %p747_p11 }
 0x16c   : > { %p500_p3 = por %p499_p1, %p498_p9 }
 0x16d   : > { %p496_p7 = pneg %p495_p5 }
 0x16e   : > { %p502_p12 = por %p501_p6, %p500_p3 }
 0x170   : > { %p503_p13 = pnand %p502_p12, %p496_p7 }
 0x172   : > { %506 = shalt.err (!%p503_p13)
}
 0x173   : > { %s552_s26 = smov 128   ;;  %s553_s30 = smov 8  }
 0x174   : > { %399 = dma.vmem_to_hbm [thread:$0]  (%p747_p11), %s688_s27, 512, %s694_s3, %s272_s4, %s552_s26, %s552_s26, %s553_s30  }
 0x175 PF: > { %s300_s17 = sand.u32 1, %s533_s6   ;;  %p748_p8 = scmp.ne.s32.totalorder %s745_s19, 0 }
 0x176   : > { %p749_p10 = scmp.ge.s32.totalorder %s545_s9, 2  ;;  %s301_s25 = scalar_lea.sflag [#allocation6], %s300_s17 }
 0x178   : > { %p406_p0 = pnand %p749_p10, %p748_p8 }
 0x17a   : > { %528 = dma.done.wait (!%p406_p0), %s301_s25, 512  }
 0x17b   : > { %530 = vsyncadd (!%p406_p0), %s301_s25, 4294966784  ;;  %p14_p2 = scmp.ge.s32.totalorder %s589_s12, 4   ;;  %s750_s6 = smov %s537_s7 }
 0x17c   : > { %s751_s7 = smov %s541_s8  ;;  %s752_s8 = smov %s601_s15 }
 0x17d   : > { %s753_s9 = smov %s589_s12  ;;  %16 = sbr.rel (!%p14_p2) target bundleno = 5 (0x5), region = 85 }
 0x184   :  { %306 = vsyncpa [#allocation5], 1 }
 0x185   :  { %308 = vsyncpa [#allocation5 + $0x1], 1 }
 0x186   :  { %309 = vsyncpa [#allocation6], 1 }
 0x187   :  { %311 = vsyncpa [#allocation6 + $0x1], 1 }

</bundles_post_ra>
